<compile_context>
chip_gen: v5e
topology: v5e:2x2
jax: 0.10.0
libtpu: 0.0.40
codegen_flags: <defaults>
</compile_context>

<pallas_src>
import functools
import math

import jax
import jax.numpy as jnp
from jax.experimental import pallas as pl
from jax.experimental.pallas import tpu as pltpu


def _mha_kernel(x_ref, w_in_ref, b_in_ref, w_out_ref, b_out_ref, o_ref, *, B, C):
    """Single-head attention over the B axis, vectorized over spatial lanes.

    x_ref, o_ref : (B*C, TS)  dense packing; row b*C + c = (batch b, channel c)
    w_in_ref     : (3*C, C)   [wq*scale; wk; wv]   (shared across the B tokens)
    b_in_ref     : (3*C, 1)   [bq*scale; bk; bv]
    w_out_ref    : (C, C)     wo
    b_out_ref    : (C, 1)     bo
    """
    w_in = w_in_ref[...]
    b_in = b_in_ref[...]
    w_out = w_out_ref[...]
    b_out = b_out_ref[...]

    # --- QKV projection: B matmuls of (3C, C) @ (C, TS) reusing the SAME
    # stacked weight (no block-diagonal kron => no B^2 weight / MXU blowup).
    q, k, v = [], [], []
    for b in range(B):
        xb = x_ref[b * C:(b + 1) * C, :]                               # (C, TS)
        qkv = jnp.dot(w_in, xb, preferred_element_type=jnp.float32) + b_in
        q.append(qkv[0 * C:1 * C, :])                                  # already scaled
        k.append(qkv[1 * C:2 * C, :])
        v.append(qkv[2 * C:3 * C, :])

    # --- Attention over the B "tokens" (PyTorch seq axis == real batch),
    # independently per lane.  One query at a time: normalize, project and
    # store before touching the next query, so live vregs stay bounded.
    for i in range(B):
        scores = [jnp.sum(q[i] * k[j], axis=0, keepdims=True) for j in range(B)]  # B x (1, TS)

        if B == 1:
            acc = v[0]
        elif B == 2:
            # softmax over two scores: p0 = 1 / (1 + exp(s1 - s0)), p1 = 1 - p0.
            # One exp (EUP) + one approx reciprocal (EUP) + a Newton step.
            d = jnp.minimum(scores[1] - scores[0], 80.0)               # clamp: exp stays finite
            e = jnp.exp(d)
            denom = 1.0 + e
            inv = pl.reciprocal(denom, approx=True)
            inv = inv * (2.0 - denom * inv)                            # 1 Newton step -> ~f32 exact
            p0 = inv
            p1 = 1.0 - p0
            acc = p0 * v[0] + p1 * v[1]
        else:
            m = scores[0]
            for j in range(1, B):
                m = jnp.maximum(m, scores[j])
            es = [jnp.exp(s - m) for s in scores]                      # EUP
            denom = es[0]
            for j in range(1, B):
                denom = denom + es[j]
            inv = pl.reciprocal(denom, approx=True)                    # EUP slot
            inv = inv * (2.0 - denom * inv)                            # 1 Newton step
            acc = es[0] * v[0]
            for j in range(1, B):
                acc = acc + es[j] * v[j]
            acc = acc * inv                                            # normalize once per query

        # Output projection for this query only; store straight into its
        # (C, TS) row range of the lane-dense output tile.
        out_i = jnp.dot(w_out, acc, preferred_element_type=jnp.float32) + b_out
        o_ref[i * C:(i + 1) * C, :] = out_i.astype(o_ref.dtype)


def _detect_num_tensorcores():
    """Best-effort: 2 TensorCores per device on v7x / v4 / v5p, else 1."""
    try:
        kind = jax.devices()[0].device_kind.lower()
        if "v7" in kind or "v4" in kind or "v5p" in kind:
            return 2
    except Exception:
        pass
    return 1


def _pick_tile(S, BC, in_bytes, out_bytes, *, num_cores,
               vmem_budget=12 * 1024 * 1024, max_lanes=32768,
               min_lanes_per_core=2048):
    """Pick the lane tile TS.

    Biggest tile that fits a conservative VMEM budget (per-step overhead is the
    dominant cost for this kernel, so bigger is better).  Only split into >= 2
    grid steps when (a) S exceeds the VMEM-budget tile, or (b) the chip has two
    TensorCores AND each core gets at least `min_lanes_per_core` lanes.
    """
    # Per-lane VMEM footprint: double-buffered in/out tiles + f32 q/k/v/acc temps.
    per_lane = BC * (2 * (in_bytes + out_bytes) + 6 * 4)
    ts_cap = max(128, min(max_lanes, (vmem_budget // per_lane) // 128 * 128))

    if S <= ts_cap:
        if num_cores >= 2 and S >= 2 * min_lanes_per_core:
            # Two steps, one per TensorCore, each with a worthwhile tile.
            ts = pl.cdiv(pl.cdiv(S, 2), 128) * 128
            return min(ts, ts_cap)
        return S          # single step; full-extent block needs no 128 alignment
    return ts_cap         # multiple of 128; ragged last block clipped by Pallas


def prepare_params(params, channel):
    """Hoisted weight prep (built once, reused every forward call).

    Stacks Q/K/V into one (3C, C) weight / (3C, 1) bias with the 1/sqrt(C)
    scale folded into the Q rows, so the kernel does no per-score scaling.
    """
    C = channel
    scale = 1.0 / math.sqrt(C)   # single head inside nn.MultiheadAttention -> head_dim == C
    w_in = jnp.concatenate(
        [params["wq"].astype(jnp.float32) * scale,
         params["wk"].astype(jnp.float32),
         params["wv"].astype(jnp.float32)], axis=0)                    # (3C, C)
    b_in = jnp.concatenate(
        [params["bq"].astype(jnp.float32) * scale,
         params["bk"].astype(jnp.float32),
         params["bv"].astype(jnp.float32)], axis=0)                    # (3C, 1)
    return {
        "w_in": w_in,
        "b_in": b_in,
        "w_out": params["wo"].astype(jnp.float32),                     # (C, C)
        "b_out": params["bo"].astype(jnp.float32),                     # (C, 1)
    }


def multihead_attention_forward(x, prep, *, compute_dtype=None, num_cores=None,
                                max_lanes=32768, vmem_budget=12 * 1024 * 1024):
    """Forward pass matching MultiHeadAttention.forward for NCHW input x.

    `prep` is the output of prepare_params() (weights prepared once, outside
    the hot path).  `compute_dtype=jnp.bfloat16` halves x/weight HBM traffic on
    v6e/v7x while keeping f32 MXU accumulation and f32 softmax math.
    """
    B, C, W, H = x.shape
    S = W * H
    BC = B * C
    if compute_dtype is None:
        compute_dtype = x.dtype
    if num_cores is None:
        num_cores = _detect_num_tensorcores()

    # Dense sublane packing: (B*C, S); row b*C + c = (batch b, channel c).
    # Contiguous reshape of NCHW -> no copy.
    x_flat = x.reshape(BC, S).astype(compute_dtype)
    w_in = prep["w_in"].astype(compute_dtype)
    b_in = prep["b_in"]            # kept f32 (added to the f32 MXU accumulator)
    w_out = prep["w_out"]          # kept f32 (tiny; output projection stays f32)
    b_out = prep["b_out"]

    out_dtype = x.dtype
    TS = _pick_tile(S, BC,
                    jnp.dtype(compute_dtype).itemsize,
                    jnp.dtype(out_dtype).itemsize,
                    num_cores=num_cores,
                    vmem_budget=vmem_budget,
                    max_lanes=max_lanes)
    grid = (pl.cdiv(S, TS),)   # no jnp.pad: ragged edge block is clipped by Pallas
                               # (attention is per-lane independent, so safe)

    out = pl.pallas_call(
        functools.partial(_mha_kernel, B=B, C=C),
        out_shape=jax.ShapeDtypeStruct((BC, S), out_dtype),
        grid_spec=pltpu.PrefetchScalarGridSpec(
            num_scalar_prefetch=0,
            grid=grid,
            in_specs=[
                pl.BlockSpec((BC, TS), lambda s: (0, s)),        # x tiles (dense sublanes, lane-wide)
                # Grid-invariant weights/biases: same block index every step,
                # so Pallas fetches them once (no re-DMA across steps).
                pl.BlockSpec((3 * C, C), lambda s: (0, 0)),      # stacked QKV weight
                pl.BlockSpec((3 * C, 1), lambda s: (0, 0)),      # stacked QKV bias
                pl.BlockSpec((C, C), lambda s: (0, 0)),          # output weight
                pl.BlockSpec((C, 1), lambda s: (0, 0)),          # output bias
            ],
            out_specs=pl.BlockSpec((BC, TS), lambda s: (0, s)),
        ),
        # VMEM budget above is conservative (< the smallest default scoped
        # limit, 16 MiB on v5e), so no vmem_limit_bytes override is needed.
        compiler_params=pltpu.CompilerParams(
            dimension_semantics=("parallel",)),
    )(x_flat, w_in, b_in, w_out, b_out)

    return out.reshape(B, C, W, H)


def init_params(key, channel):
    """Deterministic synthetic parameters matching nn.MultiheadAttention shapes."""
    ks = jax.random.split(key, 8)
    std = 1.0 / math.sqrt(channel)
    C = channel
    return {
        "wq": jax.random.normal(ks[0], (C, C), jnp.float32) * std,
        "wk": jax.random.normal(ks[1], (C, C), jnp.float32) * std,
        "wv": jax.random.normal(ks[2], (C, C), jnp.float32) * std,
        "bq": jax.random.normal(ks[3], (C, 1), jnp.float32) * 0.02,
        "bk": jax.random.normal(ks[4], (C, 1), jnp.float32) * 0.02,
        "bv": jax.random.normal(ks[5], (C, 1), jnp.float32) * 0.02,
        "wo": jax.random.normal(ks[6], (C, C), jnp.float32) * std,
        "bo": jax.random.normal(ks[7], (C, 1), jnp.float32) * 0.02,
    }


def _reference_forward(x, params):
    """Pure-JAX replica of the PyTorch forward (for numerical verification)."""
    B, C, W, H = x.shape
    S = W * H
    xf = x.reshape(B, C, S).transpose(2, 0, 1)  # (S, B, C): batch=S, seq=B, embed=C
    q = xf @ params["wq"].T + params["bq"][:, 0]
    k = xf @ params["wk"].T + params["bk"][:, 0]
    v = xf @ params["wv"].T + params["bv"][:, 0]
    scores = jnp.einsum("sic,sjc->sij", q, k) / math.sqrt(C)
    attn = jax.nn.softmax(scores, axis=-1)
    o = jnp.einsum("sij,sjc->sic", attn, v)
    o = o @ params["wo"].T + params["bo"][:, 0]
    return o.transpose(1, 2, 0).reshape(B, C, W, H)


if __name__ == "__main__":
    key = jax.random.PRNGKey(0)
    k_x, k_p = jax.random.split(key)

    B, C, W, H = 2, 4, 16, 16  # module's num_heads arg is unused (inner mha has 1 head)
    x = jax.random.normal(k_x, (B, C, W, H), jnp.float32)
    params = init_params(k_p, C)
    prep = prepare_params(params, C)   # weight prep hoisted out of the hot path

    ref = _reference_forward(x, params)

    # f32 operands: strict parity with the reference.
    out = jax.block_until_ready(multihead_attention_forward(x, prep))
    assert out.shape == (B, C, W, H)
    assert jnp.allclose(out, ref, atol=1e-4, rtol=1e-4), "f32 mismatch vs reference"

    # bf16 operands (halved x/weight HBM traffic; f32 accumulate + f32 softmax).
    out_bf16 = jax.block_until_ready(
        multihead_attention_forward(x, prep, compute_dtype=jnp.bfloat16))
    assert jnp.allclose(out_bf16, ref, atol=5e-2, rtol=5e-2), "bf16 mismatch vs reference"

    print("KERNEL_OK")
</pallas_src>

<mosaic_0001>
module attributes {stable_mosaic.version = 11 : i64} {
  func.func @_mha_kernel(%arg0: i32, %arg1: memref<8x256xf32, #tpu.memory_space<vmem>>, %arg2: memref<12x4xf32, #tpu.memory_space<vmem>>, %arg3: memref<12x1xf32, #tpu.memory_space<vmem>>, %arg4: memref<4x4xf32, #tpu.memory_space<vmem>>, %arg5: memref<4x1xf32, #tpu.memory_space<vmem>>, %arg6: memref<8x256xf32, #tpu.memory_space<vmem>>) attributes {dimension_semantics = [#tpu.dimension_semantics<parallel>], iteration_bounds = array<i64: 1>, scalar_prefetch = 0 : i64, scratch_operands = 0 : i64, tpu.core_type = #tpu.core_type<tc>, window_params = [{transform_indices = @transform_0, window_bounds = array<i64: 8, 256>}, {pipeline_mode = #tpu.pipeline_mode<synchronous>, transform_indices = @transform_1, window_bounds = array<i64: 12, 4>}, {pipeline_mode = #tpu.pipeline_mode<synchronous>, transform_indices = @transform_2, window_bounds = array<i64: 12, 1>}, {pipeline_mode = #tpu.pipeline_mode<synchronous>, transform_indices = @transform_3, window_bounds = array<i64: 4, 4>}, {pipeline_mode = #tpu.pipeline_mode<synchronous>, transform_indices = @transform_4, window_bounds = array<i64: 4, 1>}, {transform_indices = @transform_5, window_bounds = array<i64: 8, 256>}]} {
    %c0 = arith.constant 0 : index
    %c0_0 = arith.constant 0 : index
    %0 = vector.load %arg2[%c0, %c0_0] : memref<12x4xf32, #tpu.memory_space<vmem>>, vector<12x4xf32>
    %c0_1 = arith.constant 0 : index
    %c0_2 = arith.constant 0 : index
    %1 = vector.load %arg3[%c0_1, %c0_2] : memref<12x1xf32, #tpu.memory_space<vmem>>, vector<12x1xf32>
    %c0_3 = arith.constant 0 : index
    %c0_4 = arith.constant 0 : index
    %2 = vector.load %arg4[%c0_3, %c0_4] : memref<4x4xf32, #tpu.memory_space<vmem>>, vector<4x4xf32>
    %c0_5 = arith.constant 0 : index
    %c0_6 = arith.constant 0 : index
    %3 = vector.load %arg5[%c0_5, %c0_6] : memref<4x1xf32, #tpu.memory_space<vmem>>, vector<4x1xf32>
    %c0_7 = arith.constant 0 : index
    %c0_8 = arith.constant 0 : index
    %4 = vector.load %arg1[%c0_7, %c0_8] : memref<8x256xf32, #tpu.memory_space<vmem>>, vector<4x256xf32>
    %cst = arith.constant dense<0.000000e+00> : vector<12x256xf32>
    %5 = tpu.matmul %0, %4, %cst {dimension_numbers = #tpu.dot_dimension_numbers<[1], [0], [0], [1], [0, 0, 1, 1], [], []>} : vector<12x4xf32>, vector<4x256xf32>, vector<12x256xf32> -> vector<12x256xf32>
    %6 = vector.broadcast %1 : vector<12x1xf32> to vector<12x256xf32>
    %7 = arith.addf %5, %6 : vector<12x256xf32>
    %8 = vector.extract_strided_slice %7 {offsets = [0, 0], sizes = [4, 256], strides = [1, 1]} : vector<12x256xf32> to vector<4x256xf32>
    %9 = vector.extract_strided_slice %7 {offsets = [4, 0], sizes = [4, 256], strides = [1, 1]} : vector<12x256xf32> to vector<4x256xf32>
    %10 = vector.extract_strided_slice %7 {offsets = [8, 0], sizes = [4, 256], strides = [1, 1]} : vector<12x256xf32> to vector<4x256xf32>
    %c4 = arith.constant 4 : index
    %c0_9 = arith.constant 0 : index
    %11 = vector.load %arg1[%c4, %c0_9] : memref<8x256xf32, #tpu.memory_space<vmem>>, vector<4x256xf32>
    %cst_10 = arith.constant dense<0.000000e+00> : vector<12x256xf32>
    %12 = tpu.matmul %0, %11, %cst_10 {dimension_numbers = #tpu.dot_dimension_numbers<[1], [0], [0], [1], [0, 0, 1, 1], [], []>} : vector<12x4xf32>, vector<4x256xf32>, vector<12x256xf32> -> vector<12x256xf32>
    %13 = vector.broadcast %1 : vector<12x1xf32> to vector<12x256xf32>
    %14 = arith.addf %12, %13 : vector<12x256xf32>
    %15 = vector.extract_strided_slice %14 {offsets = [0, 0], sizes = [4, 256], strides = [1, 1]} : vector<12x256xf32> to vector<4x256xf32>
    %16 = vector.extract_strided_slice %14 {offsets = [4, 0], sizes = [4, 256], strides = [1, 1]} : vector<12x256xf32> to vector<4x256xf32>
    %17 = vector.extract_strided_slice %14 {offsets = [8, 0], sizes = [4, 256], strides = [1, 1]} : vector<12x256xf32> to vector<4x256xf32>
    %18 = arith.mulf %8, %9 : vector<4x256xf32>
    %cst_11 = arith.constant dense<0.000000e+00> : vector<256xf32>
    %19 = vector.multi_reduction <add>, %18, %cst_11 [0] : vector<4x256xf32> to vector<256xf32>
    %20 = vector.shape_cast %19 : vector<256xf32> to vector<1x256xf32>
    %21 = arith.mulf %8, %16 : vector<4x256xf32>
    %cst_12 = arith.constant dense<0.000000e+00> : vector<256xf32>
    %22 = vector.multi_reduction <add>, %21, %cst_12 [0] : vector<4x256xf32> to vector<256xf32>
    %23 = vector.shape_cast %22 : vector<256xf32> to vector<1x256xf32>
    %24 = arith.subf %23, %20 : vector<1x256xf32>
    %cst_13 = arith.constant 8.000000e+01 : f32
    %25 = vector.broadcast %cst_13 : f32 to vector<1x256xf32>
    %26 = arith.minimumf %24, %25 : vector<1x256xf32>
    %27 = math.exp %26 : vector<1x256xf32>
    %cst_14 = arith.constant 1.000000e+00 : f32
    %28 = vector.broadcast %cst_14 : f32 to vector<1x256xf32>
    %29 = arith.addf %28, %27 : vector<1x256xf32>
    %30 = tpu.reciprocal %29 {approx = true} : vector<1x256xf32> -> vector<1x256xf32>
    %31 = arith.mulf %29, %30 : vector<1x256xf32>
    %cst_15 = arith.constant 2.000000e+00 : f32
    %32 = vector.broadcast %cst_15 : f32 to vector<1x256xf32>
    %33 = arith.subf %32, %31 : vector<1x256xf32>
    %34 = arith.mulf %30, %33 : vector<1x256xf32>
    %cst_16 = arith.constant 1.000000e+00 : f32
    %35 = vector.broadcast %cst_16 : f32 to vector<1x256xf32>
    %36 = arith.subf %35, %34 : vector<1x256xf32>
    %37 = vector.broadcast %34 : vector<1x256xf32> to vector<4x256xf32>
    %38 = arith.mulf %37, %10 : vector<4x256xf32>
    %39 = vector.broadcast %36 : vector<1x256xf32> to vector<4x256xf32>
    %40 = arith.mulf %39, %17 : vector<4x256xf32>
    %41 = arith.addf %38, %40 : vector<4x256xf32>
    %cst_17 = arith.constant dense<0.000000e+00> : vector<4x256xf32>
    %42 = tpu.matmul %2, %41, %cst_17 {dimension_numbers = #tpu.dot_dimension_numbers<[1], [0], [0], [1], [0, 0, 1, 1], [], []>} : vector<4x4xf32>, vector<4x256xf32>, vector<4x256xf32> -> vector<4x256xf32>
    %43 = vector.broadcast %3 : vector<4x1xf32> to vector<4x256xf32>
    %44 = arith.addf %42, %43 : vector<4x256xf32>
    %c0_18 = arith.constant 0 : index
    %c0_19 = arith.constant 0 : index
    %45 = vector.load %arg6[%c0_18, %c0_19] : memref<8x256xf32, #tpu.memory_space<vmem>>, vector<4x256xf32>
    tpu.vector_store %arg6[%c0_18, %c0_19], %44 {strides = array<i32>} : memref<8x256xf32, #tpu.memory_space<vmem>>, vector<4x256xf32>,
    %46 = arith.mulf %15, %9 : vector<4x256xf32>
    %cst_20 = arith.constant dense<0.000000e+00> : vector<256xf32>
    %47 = vector.multi_reduction <add>, %46, %cst_20 [0] : vector<4x256xf32> to vector<256xf32>
    %48 = vector.shape_cast %47 : vector<256xf32> to vector<1x256xf32>
    %49 = arith.mulf %15, %16 : vector<4x256xf32>
    %cst_21 = arith.constant dense<0.000000e+00> : vector<256xf32>
    %50 = vector.multi_reduction <add>, %49, %cst_21 [0] : vector<4x256xf32> to vector<256xf32>
    %51 = vector.shape_cast %50 : vector<256xf32> to vector<1x256xf32>
    %52 = arith.subf %51, %48 : vector<1x256xf32>
    %cst_22 = arith.constant 8.000000e+01 : f32
    %53 = vector.broadcast %cst_22 : f32 to vector<1x256xf32>
    %54 = arith.minimumf %52, %53 : vector<1x256xf32>
    %55 = math.exp %54 : vector<1x256xf32>
    %cst_23 = arith.constant 1.000000e+00 : f32
    %56 = vector.broadcast %cst_23 : f32 to vector<1x256xf32>
    %57 = arith.addf %56, %55 : vector<1x256xf32>
    %58 = tpu.reciprocal %57 {approx = true} : vector<1x256xf32> -> vector<1x256xf32>
    %59 = arith.mulf %57, %58 : vector<1x256xf32>
    %cst_24 = arith.constant 2.000000e+00 : f32
    %60 = vector.broadcast %cst_24 : f32 to vector<1x256xf32>
    %61 = arith.subf %60, %59 : vector<1x256xf32>
    %62 = arith.mulf %58, %61 : vector<1x256xf32>
    %cst_25 = arith.constant 1.000000e+00 : f32
    %63 = vector.broadcast %cst_25 : f32 to vector<1x256xf32>
    %64 = arith.subf %63, %62 : vector<1x256xf32>
    %65 = vector.broadcast %62 : vector<1x256xf32> to vector<4x256xf32>
    %66 = arith.mulf %65, %10 : vector<4x256xf32>
    %67 = vector.broadcast %64 : vector<1x256xf32> to vector<4x256xf32>
    %68 = arith.mulf %67, %17 : vector<4x256xf32>
    %69 = arith.addf %66, %68 : vector<4x256xf32>
    %cst_26 = arith.constant dense<0.000000e+00> : vector<4x256xf32>
    %70 = tpu.matmul %2, %69, %cst_26 {dimension_numbers = #tpu.dot_dimension_numbers<[1], [0], [0], [1], [0, 0, 1, 1], [], []>} : vector<4x4xf32>, vector<4x256xf32>, vector<4x256xf32> -> vector<4x256xf32>
    %71 = vector.broadcast %3 : vector<4x1xf32> to vector<4x256xf32>
    %72 = arith.addf %70, %71 : vector<4x256xf32>
    %c4_27 = arith.constant 4 : index
    %c0_28 = arith.constant 0 : index
    %73 = vector.load %arg6[%c4_27, %c0_28] : memref<8x256xf32, #tpu.memory_space<vmem>>, vector<4x256xf32>
    tpu.vector_store %arg6[%c4_27, %c0_28], %72 {strides = array<i32>} : memref<8x256xf32, #tpu.memory_space<vmem>>, vector<4x256xf32>,
    return
  }
  func.func @transform_0(%arg0: i32) -> (i32, i32) {
    %c0_i32 = arith.constant 0 : i32
    %c0_i32_0 = arith.constant 0 : i32
    return %c0_i32, %arg0 : i32, i32
  }
  func.func @transform_1(%arg0: i32) -> (i32, i32) {
    %c0_i32 = arith.constant 0 : i32
    %c0_i32_0 = arith.constant 0 : i32
    %c0_i32_1 = arith.constant 0 : i32
    return %c0_i32, %c0_i32_0 : i32, i32
  }
  func.func @transform_2(%arg0: i32) -> (i32, i32) {
    %c0_i32 = arith.constant 0 : i32
    %c0_i32_0 = arith.constant 0 : i32
    %c0_i32_1 = arith.constant 0 : i32
    return %c0_i32, %c0_i32_0 : i32, i32
  }
  func.func @transform_3(%arg0: i32) -> (i32, i32) {
    %c0_i32 = arith.constant 0 : i32
    %c0_i32_0 = arith.constant 0 : i32
    %c0_i32_1 = arith.constant 0 : i32
    return %c0_i32, %c0_i32_0 : i32, i32
  }
  func.func @transform_4(%arg0: i32) -> (i32, i32) {
    %c0_i32 = arith.constant 0 : i32
    %c0_i32_0 = arith.constant 0 : i32
    %c0_i32_1 = arith.constant 0 : i32
    return %c0_i32, %c0_i32_0 : i32, i32
  }
  func.func @transform_5(%arg0: i32) -> (i32, i32) {
    %c0_i32 = arith.constant 0 : i32
    %c0_i32_0 = arith.constant 0 : i32
    return %c0_i32, %arg0 : i32, i32
  }
}

</mosaic_0001>

<bundles_post_ra>
// kernel: tpu_custom_call.1
= control target key start
LH: loop header
LB: loop body
LE: loop exit
PB: predicated region body
PF: predicated region fallthrough
CT: control target
= control target key end

     0   :  { %vm46_vm0 = vcmask 1043456   ;;  %vm39_vm1 = vcmask 31744   ;;  %v475_v7 = vmov 0   ;;  %s568_s0 = inlined_call_operand.vmem [shape: f32[8,256], index: 0, kind: input, shape index: {}]   ;;  %s569_s1 = inlined_call_operand.vmem [shape: f32[12,4], index: 1, kind: input, shape index: {}]   ;;  %s570_s2 = inlined_call_operand.vmem [shape: f32[12,1], index: 2, kind: input, shape index: {}]   ;;  %s571_s3 = inlined_call_operand.vmem [shape: f32[4,4], index: 3, kind: input, shape index: {}]   ;;  %s572_s4 = inlined_call_operand.vmem [shape: f32[4,1], index: 4, kind: input, shape index: {}]   ;;  %s573_s5 = inlined_call_operand.hbm [shape: f32[8,256], index: 5, kind: output, shape index: {}]  }
   0x1   :  { %v27_v0 = vld [vmem:[%s568_s0] sm:$0xf]  ;;  %v28_v1 = vld [vmem:[%s568_s0 + $0x8] sm:$0xf]  ;;  %v99_v3 = vld [vmem:[%s568_s0] sm:$0xf0]  ;;  %431 = vset.pattern.permute.xlu0 %v475_v7  ;;  %432 = vset.pattern.permute.xlu1 %v475_v7 }
   0x2   :  { %v21_v2 = vld [vmem:[%s569_s1] sm:$0xff]  ;;  %409 = vmatpush.msk.msra.mxu0 %vm46_vm0, %v27_v0  ;;  %412 = vmatpush.msk.msra.mxu1 %vm46_vm0, %v28_v1  ;;  %v100_v4 = vld [vmem:[%s568_s0 + $0x8] sm:$0xf0]  ;;  %v103_v5 = vrot.slane %v99_v3, 4 }
   0x3   :  { %410 = vmatmul.msk.f32.vlgmr.msra.gmra.mxu0 %vm39_vm1, %v21_v2  ;;  %413 = vmatmul.msk.f32.vlgmr.msra.gmra.mxu1 %vm39_vm1, %v21_v2  ;;  %v104_v6 = vrot.slane %v100_v4, 4  ;;  %v23_v8 = vld [vmem:[%s570_s2] sm:$0xff] }
   0x4   :  { %10 = vsyncpa [#allocation3], 0  ;;  %415 = vmatpush.msk.msra.mxu2 %vm46_vm0, %v103_v5  ;;  %31 = vperm.xlu0 %431, %v23_v8   ;;  %v22_v9 = vld [vmem:[%s569_s1 + $0x8] sm:$0xf]  ;;  %s400_s12 = sshll.u32 %s573_s5, 4  ;;  %s401_s12 = int_to_ptr.hbm [resolvable:$true] %s400_s12 }
   0x5   :  { %418 = vmatpush.msk.msra.mxu3 %vm46_vm0, %v104_v6  ;;  %416 = vmatmul.msk.f32.vlgmr.msra.gmra.mxu2 %vm39_vm1, %v21_v2  ;;  %v24_v10 = vld [vmem:[%s570_s2 + $0x8] sm:$0xf] }
   0x6   :  { %419 = vmatmul.msk.f32.vlgmr.msra.gmra.mxu3 %vm39_vm1, %v21_v2 }
   0xb   :  { %411 = vmatmul.msk.f32.gmra.mxu0 %vm39_vm1, %v22_v9  ;;  %414 = vmatmul.msk.f32.gmra.mxu1 %vm39_vm1, %v22_v9 }
   0xc   :  { %36 = vperm.xlu0 %431, %v24_v10  }
   0xd   :  { %417 = vmatmul.msk.f32.gmra.mxu2 %vm39_vm1, %v22_v9 }
   0xe   :  { %420 = vmatmul.msk.f32.gmra.mxu3 %vm39_vm1, %v22_v9 }
  0x76   :  { %v32_v11 = vpop.permute.xlu0 %31 }
  0x80   :  { %v70_v12 = vpop.f32.mrf.mxu0  ;;  %v93_v13 = vpop.f32.mrf.mxu1 }
  0x81   :  { %v71_v14 = vadd.f32 %v70_v12, %v32_v11  ;;  %v94_v15 = vadd.f32 %v93_v13, %v32_v11 }
  0x83   :  { %v157_v16 = vrot.slane %v71_v14, 4  ;;  %v158_v17 = vrot.slane %v94_v15, 4 }
  0x85   :  { %v161_v18 = vmul.f32 %v157_v16, %v71_v14  ;;  %v162_v19 = vmul.f32 %v158_v17, %v94_v15 }
  0x87   :  { %v163_v20 = vsel %vm46_vm0, %v161_v18, 0.0  ;;  %v170_v21 = vsel %vm46_vm0, %v162_v19, 0.0 }
  0x88   :  { %v164_v22 = vrot.slane %v163_v20, 4  ;;  %v171_v23 = vrot.slane %v170_v21, 4  ;;  %v126_v24 = vpop.f32.mrf.mxu2 }
  0x89   :  { %v149_v25 = vpop.f32.mrf.mxu3  ;;  %v127_v28 = vadd.f32 %v126_v24, %v32_v11 }
  0x8a   :  { %v165_v26 = vadd.f32 %v164_v22, %v163_v20  ;;  %v172_v27 = vadd.f32 %v171_v23, %v170_v21  ;;  %v150_v29 = vadd.f32 %v149_v25, %v32_v11 }
  0x8b   :  { %v179_v30 = vrot.slane %v127_v28, 4  ;;  %v281_v31 = vmul.f32 %v157_v16, %v127_v28 }
  0x8c   :  { %v180_v32 = vrot.slane %v150_v29, 4  ;;  %v282_v33 = vmul.f32 %v158_v17, %v150_v29  ;;  %v166_v34 = vrot.slane %v165_v26, 2  ;;  %v173_v35 = vrot.slane %v172_v27, 2 }
  0x8d   :  { %v183_v36 = vmul.f32 %v179_v30, %v71_v14  ;;  %v283_v37 = vsel %vm46_vm0, %v281_v31, 0.0  ;;  %v297_v39 = vmul.f32 %v179_v30, %v127_v28 }
  0x8e   :  { %v284_v38 = vrot.slane %v283_v37, 4  ;;  %v184_v40 = vmul.f32 %v180_v32, %v94_v15  ;;  %v290_v41 = vsel %vm46_vm0, %v282_v33, 0.0  ;;  %v167_v48 = vadd.f32 %v166_v34, %v165_v26 }
  0x8f   :  { %v185_v42 = vsel %vm46_vm0, %v183_v36, 0.0  ;;  %v291_v43 = vrot.slane %v290_v41, 4  ;;  %v299_v46 = vsel %vm46_vm0, %v297_v39, 0.0  ;;  %v174_v49 = vadd.f32 %v173_v35, %v172_v27  ;;  %v26_v35 = vld [vmem:[%s572_s4] sm:$0xf] }
  0x90   :  { %v186_v44 = vrot.slane %v185_v42, 4  ;;  %v285_v45 = vadd.f32 %v284_v38, %v283_v37  ;;  %v192_v47 = vsel %vm46_vm0, %v184_v40, 0.0  ;;  %v300_v50 = vrot.slane %v299_v46, 4  ;;  %227 = vperm.xlu1 %432, %v26_v35  }
  0x91   :  { %v193_v51 = vrot.slane %v192_v47, 4  ;;  %v292_v54 = vadd.f32 %v291_v43, %v290_v41  ;;  %v298_v55 = vmul.f32 %v180_v32, %v150_v29  ;;  %v168_v1 = vrot.slane %v167_v48, 1 }
  0x92   :  { %v187_v52 = vadd.f32 %v186_v44, %v185_v42  ;;  %v286_v53 = vrot.slane %v285_v45, 2  ;;  %v301_v56 = vadd.f32 %v300_v50, %v299_v46  ;;  %v175_v2 = vrot.slane %v174_v49, 1  ;;  %v37_v50 = vpop.permute.xlu0 %36 }
  0x93   :  { %v194_v57 = vadd.f32 %v193_v51, %v192_v47  ;;  %v293_v60 = vrot.slane %v292_v54, 2  ;;  %v306_v61 = vsel %vm46_vm0, %v298_v55, 0.0  ;;  %v169_v13 = vadd.f32 %v168_v1, %v167_v48 }
  0x94   :  { %v188_v58 = vrot.slane %v187_v52, 2  ;;  %v287_v59 = vadd.f32 %v286_v53, %v285_v45  ;;  %v302_v62 = vrot.slane %v301_v56, 2  ;;  %v307_v0 = vrot.slane %v306_v61, 4  ;;  %v73_v53 = vpop.f32.mrf.mxu0 }
  0x95   :  { %v195_v63 = vrot.slane %v194_v57, 2  ;;  %v294_v7 = vadd.f32 %v293_v60, %v292_v54  ;;  %v176_v14 = vadd.f32 %v175_v2, %v174_v49  ;;  %v129_v54 = vpop.f32.mrf.mxu2 }
  0x96   :  { %v189_v3 = vadd.f32 %v188_v58, %v187_v52  ;;  %v288_v4 = vrot.slane %v287_v59, 1  ;;  %v303_v5 = vadd.f32 %v302_v62, %v301_v56  ;;  %v308_v8 = vadd.f32 %v307_v0, %v306_v61  ;;  %v152_v61 = vpop.f32.mrf.mxu3 }
  0x97   :  { %v196_v6 = vadd.f32 %v195_v63, %v194_v57  ;;  %v295_v19 = vrot.slane %v294_v7, 1  ;;  %v96_v57 = vpop.f32.mrf.mxu1  ;;  %v74_v63 = vadd.f32 %v73_v53, %v37_v50  ;;  %v130_v0 = vadd.f32 %v129_v54, %v37_v50 }
  0x98   :  { %v190_v9 = vrot.slane %v189_v3, 1  ;;  %v304_v10 = vrot.slane %v303_v5, 1  ;;  %v309_v12 = vrot.slane %v308_v8, 2  ;;  %v289_v16 = vadd.f32 %v288_v4, %v287_v59 }
  0x99   :  { %v197_v11 = vrot.slane %v196_v6, 1  ;;  %v296_v26 = vadd.f32 %v295_v19, %v294_v7  ;;  %v153_v7 = vadd.f32 %v152_v61, %v37_v50 }
  0x9a   :  { %v191_v15 = vadd.f32 %v190_v9, %v189_v3  ;;  %v305_v17 = vadd.f32 %v304_v10, %v303_v5  ;;  %v310_v20 = vadd.f32 %v309_v12, %v308_v8  ;;  %v97_v3 = vadd.f32 %v96_v57, %v37_v50 }
  0x9b   :  { %v198_v18 = vadd.f32 %v197_v11, %v196_v6 }
  0x9c   :  { %v199_v21 = vsub.f32 %v191_v15, %v169_v13  ;;  %v313_v22 = vsub.f32 %v305_v17, %v289_v16  ;;  %v311_v23 = vrot.slane %v310_v20, 1 }
  0x9d   :  { %v200_v24 = vsub.f32 %v198_v18, %v176_v14  ;;  %v25_v18 = vld [vmem:[%s571_s3] sm:$0xf]  ;;  %s476_s3 = smov [#allocation2]  }
  0x9e   :  { %v201_v25 = vmin.f32 %v199_v21, 80.0  ;;  %v312_v27 = vadd.f32 %v311_v23, %v310_v20  ;;  %v315_v28 = vmin.f32 %v313_v22, 80.0  ;;  %s398_s9 = sshll.u32 %s476_s3, 4  ;;  %s399_s9 = int_to_ptr.vmem [resolvable:$true] %s398_s9 }
  0x9f   :  { %v202_v29 = vmin.f32 %v200_v24, 80.0 }
  0xa0   :  { %v203_v30 = vmul.f32 1.442695, %v201_v25  ;;  %v314_v31 = vsub.f32 %v312_v27, %v296_v26  ;;  %v317_v32 = vmul.f32 1.442695, %v315_v28 }
  0xa1   :  { %v205_v33 = vmul.f32 1.442695, %v202_v29 }
  0xa2   :  { %433 = vpow2.f32 %v203_v30  ;;  %v316_v34 = vmin.f32 %v314_v31, 80.0 }
  0xa3   :  { %435 = vpow2.f32 %v317_v32 }
  0xa4   :  { %437 = vpow2.f32 %v205_v33  ;;  %v319_v36 = vmul.f32 1.442695, %v316_v34 }
  0xa6   :  { %439 = vpow2.f32 %v319_v36 }
  0xa8   :  { %v434_v37 = vpop.eup %433 }
  0xa9   :  { %v436_v38 = vpop.eup %435  ;;  %v207_v39 = vadd.f32 1.0, %v434_v37 }
  0xaa   :  { %v438_v40 = vpop.eup %437  ;;  %v321_v41 = vadd.f32 1.0, %v436_v38 }
  0xab   :  { %441 = vrcp.f32 %v207_v39  ;;  %v208_v42 = vadd.f32 1.0, %v438_v40 }
  0xac   :  { %443 = vrcp.f32 %v321_v41  ;;  %v440_v43 = vpop.eup %439 }
  0xad   :  { %445 = vrcp.f32 %v208_v42  ;;  %v322_v44 = vadd.f32 1.0, %v440_v43 }
  0xaf   :  { %447 = vrcp.f32 %v322_v44 }
  0xb1   :  { %v442_v45 = vpop.eup %441 }
  0xb2   :  { %v444_v46 = vpop.eup %443  ;;  %v211_v47 = vmul.f32 %v442_v45, %v207_v39 }
  0xb3   :  { %v446_v48 = vpop.eup %445  ;;  %v325_v49 = vmul.f32 %v444_v46, %v321_v41 }
  0xb4   :  { %v213_v51 = vsub.f32 2.0, %v211_v47  ;;  %v212_v52 = vmul.f32 %v446_v48, %v208_v42 }
  0xb5   :  { %v327_v55 = vsub.f32 2.0, %v325_v49  ;;  %v448_v56 = vpop.eup %447 }
  0xb6   :  { %v215_v58 = vmul.f32 %v442_v45, %v213_v51  ;;  %v214_v59 = vsub.f32 2.0, %v212_v52  ;;  %v326_v62 = vmul.f32 %v448_v56, %v322_v44 }
  0xb7   :  { %v329_v60 = vmul.f32 %v444_v46, %v327_v55 }
  0xb8   :  { %v217_v1 = vsub.f32 1.0, %v215_v58  ;;  %v216_v2 = vmul.f32 %v446_v48, %v214_v59  ;;  %v328_v5 = vsub.f32 2.0, %v326_v62  ;;  %v219_v9 = vmul.f32 %v215_v58, %v74_v63 }
  0xb9   :  { %v331_v4 = vsub.f32 1.0, %v329_v60  ;;  %v333_v12 = vmul.f32 %v329_v60, %v74_v63 }
  0xba   :  { %v221_v6 = vmul.f32 %v217_v1, %v130_v0  ;;  %v218_v8 = vsub.f32 1.0, %v216_v2  ;;  %v330_v11 = vmul.f32 %v448_v56, %v328_v5  ;;  %v220_v15 = vmul.f32 %v216_v2, %v97_v3 }
  0xbb   :  { %v335_v10 = vmul.f32 %v331_v4, %v130_v0 }
  0xbc   :  { %v222_v13 = vmul.f32 %v218_v8, %v153_v7  ;;  %v223_v14 = vadd.f32 %v221_v6, %v219_v9  ;;  %v332_v16 = vsub.f32 1.0, %v330_v11  ;;  %v334_v21 = vmul.f32 %v330_v11, %v97_v3 }
  0xbd   :  { %v337_v17 = vadd.f32 %v335_v10, %v333_v12 }
  0xbe   :  { %421 = vmatpush.msk.msrb.mxu0 %vm46_vm0, %v223_v14  ;;  %v224_v19 = vadd.f32 %v222_v13, %v220_v15  ;;  %v336_v20 = vmul.f32 %v332_v16, %v153_v7 }
  0xbf   :  { %425 = vmatpush.msk.msrb.mxu2 %vm46_vm0, %v337_v17  ;;  %422 = vmatmul.msk.f32.vlgmr.msrb.gmra.mxu0 %vm39_vm1, %v25_v18 }
  0xc0   :  { %423 = vmatpush.msk.msrb.mxu1 %vm46_vm0, %v224_v19  ;;  %426 = vmatmul.msk.f32.vlgmr.msrb.gmra.mxu2 %vm39_vm1, %v25_v18  ;;  %v338_v22 = vadd.f32 %v336_v20, %v334_v21 }
  0xc1   :  { %424 = vmatmul.msk.f32.vlgmr.msrb.gmra.mxu1 %vm39_vm1, %v25_v18 }
  0xc2   :  { %427 = vmatpush.msk.msrb.mxu3 %vm46_vm0, %v338_v22 }
  0xc3   :  { %428 = vmatmul.msk.f32.vlgmr.msrb.gmra.mxu3 %vm39_vm1, %v25_v18 }
 0x102   :  { %v228_v23 = vpop.permute.xlu1 %227 }
 0x13c   :  { %v256_v24 = vpop.f32.mrf.mxu0 }
 0x13d   :  { %v257_v25 = vadd.f32 %v256_v24, %v228_v23 }
 0x13e   :  { %v276_v26 = vpop.f32.mrf.mxu1 }
 0x13f   :  { %279 = vst [vmem:[#allocation2] sm:$0xf] %v257_v25  ;;  %v277_v27 = vadd.f32 %v276_v26, %v228_v23 }
 0x141   :  { %280 = vst [vmem:[#allocation2 + $0x8] sm:$0xf] %v277_v27 }
 0x143   :  { %v362_v28 = vpop.f32.mrf.mxu2 }
 0x144   :  { %v363_v29 = vadd.f32 %v362_v28, %v228_v23 }
 0x146   :  { %v387_v30 = vrot.slane %v363_v29, 4  ;;  %v382_v31 = vpop.f32.mrf.mxu3 }
 0x147   :  { %v383_v32 = vadd.f32 %v382_v31, %v228_v23 }
 0x148   :  { %391 = vst [vmem:[#allocation2] sm:$0xf0] %v387_v30 }
 0x149   :  { %v388_v33 = vrot.slane %v383_v32, 4 }
 0x14b   :  { %392 = vst [vmem:[#allocation2 + $0x8] sm:$0xf0] %v388_v33 }
 0x14c   :  { %403 = dma.vmem_to_hbm [thread:$0]  %s399_s9, 256, %s401_s12, [#allocation3]  }
 0x14d   :  { %473 = dma.done.wait [#allocation3], 256  }
 0x14e   :  { %474 = vsyncadd [#allocation3], 4294967040 }
 0x14f   :  { %408 = vsyncpa [#allocation3], 1 }

</bundles_post_ra>
